<compile_context>
chip_gen: v6e
topology: v6e:2x2x1
jax: 0.10.0
libtpu: 0.0.40
codegen_flags: <defaults>
</compile_context>

<pallas_src>
import functools
import math

import jax
import jax.numpy as jnp
from jax.experimental import pallas as pl
from jax.experimental.pallas import tpu as pltpu


# ---------------------------------------------------------------------------
# Tiling policy
# ---------------------------------------------------------------------------
_SPLIT_THRESHOLD_BYTES = 1 << 20     # above this input size, force >=2 grid steps
_TARGET_BLOCK_IN_BYTES = 3 << 20     # ~3 MiB of input per grid step (2-4 MiB target)
_MAX_WORKING_SET_BYTES = 28 << 20    # double-buffered (in + 2x out) cap; safe on v7x


def _round_up(x, m):
    return ((x + m - 1) // m) * m


def _plan_row_tile(num_rows, d, itemsize, split_threshold):
    """Pick the row-tile size tb (or None if row tiling alone can't fit VMEM)."""
    per_row_bytes = 3 * d * itemsize                 # 1x input row + 2x output row
    total_in_bytes = num_rows * d * itemsize

    # Small slabs / too few rows: one full-extent block (legal for any row count).
    if num_rows < 16 or total_in_bytes <= split_threshold:
        if 2 * num_rows * per_row_bytes <= _MAX_WORKING_SET_BYTES:
            return num_rows
        if num_rows < 16:
            return None                              # rows too wide to tile by rows

    tb_cap = (_MAX_WORKING_SET_BYTES // (2 * per_row_bytes)) // 8 * 8
    if tb_cap < 8:
        return None

    # >=2 (and even) grid steps so the "parallel" row axis splits across the
    # two v7x TensorCores and DMA/compute pipelining has work to overlap.
    n_steps = max(2, pl.cdiv(total_in_bytes, _TARGET_BLOCK_IN_BYTES))
    if n_steps % 2:
        n_steps += 1
    tb = _round_up(pl.cdiv(num_rows, n_steps), 8)
    return max(8, min(tb, tb_cap))


# ---------------------------------------------------------------------------
# Kernels
# ---------------------------------------------------------------------------
def _periodic_kernel(x_ref, out_ref, *, scale, activation):
    # TODO(synk): a shared sin/cos range reduction would trim ~30-40% of the
    # per-element VPU work on v7x where this kernel is VALU-bound.
    x = x_ref[...].astype(jnp.float32)
    xs = x * jnp.float32(scale)
    y = jnp.concatenate([jnp.cos(xs), jnp.sin(xs)], axis=-1)   # fused concat
    y = activation(y)
    out_ref[...] = y.astype(out_ref.dtype)


def _periodic_kernel_bias(x_ref, b_ref, out_ref, *, scale, activation):
    x = x_ref[...].astype(jnp.float32)
    xs = x * jnp.float32(scale)
    y = jnp.concatenate([jnp.cos(xs), jnp.sin(xs)], axis=-1)   # fused concat
    y = y + b_ref[...]                                         # fused bias epilogue
    y = activation(y)
    out_ref[...] = y.astype(out_ref.dtype)


# ---------------------------------------------------------------------------
# pallas_call wrapper on a (R, d) slab -> (R, 2*d) slab
# ---------------------------------------------------------------------------
def _periodic_features_pallas(x2d, scale, bias_row, activation, row_tile):
    num_rows, d = x2d.shape
    dtype = x2d.dtype
    itemsize = jnp.dtype(dtype).itemsize

    tb = row_tile
    grid = (pl.cdiv(num_rows, tb),)

    in_specs = [pl.BlockSpec((tb, d), lambda i: (i, 0))]
    operands = [x2d]
    if bias_row is not None:
        in_specs.append(pl.BlockSpec((1, 2 * d), lambda i: (0, 0)))
        operands.append(bias_row)
        kernel = functools.partial(_periodic_kernel_bias, scale=scale,
                                   activation=activation)
    else:
        kernel = functools.partial(_periodic_kernel, scale=scale,
                                   activation=activation)

    # Double-buffered working set: input block + output block (+ tiny bias row).
    block_bytes = tb * d * itemsize + tb * 2 * d * itemsize
    if bias_row is not None:
        block_bytes += 2 * d * 4
    vmem_needed = 2 * block_bytes
    # Actual need + headroom; never at physical VMEM (v7x has only 64 MiB).
    vmem_limit = int(min(max(int(vmem_needed * 1.5) + (2 << 20), 32 << 20), 48 << 20))

    n_elem = num_rows * d
    cost = pl.CostEstimate(
        flops=2 * n_elem,                 # scale mul + epilogue
        transcendentals=2 * n_elem,       # one sin + one cos per element
        bytes_accessed=3 * n_elem * itemsize,
    )

    return pl.pallas_call(
        kernel,
        out_shape=jax.ShapeDtypeStruct((num_rows, 2 * d), dtype),
        grid_spec=pltpu.PrefetchScalarGridSpec(
            num_scalar_prefetch=0,
            grid=grid,
            in_specs=in_specs,
            out_specs=pl.BlockSpec((tb, 2 * d), lambda i: (i, 0)),
        ),
        compiler_params=pltpu.CompilerParams(
            dimension_semantics=("parallel",),
            vmem_limit_bytes=vmem_limit,
        ),
        cost_estimate=cost,
    )(*operands)


# ---------------------------------------------------------------------------
# Module
# ---------------------------------------------------------------------------
class PeriodicFeaturesElementwisePallas:
    """JAX/Pallas port of the given PeriodicFeaturesElementwise forward pass."""

    def __init__(self, ndim, ind, scale=1.0, bias=False, activation=None,
                 min_pallas_numel=16384,
                 split_threshold_bytes=_SPLIT_THRESHOLD_BYTES,
                 fuse_epilogue=True):
        self.ndim = int(ndim)
        ind = [int(i) for i in ind]
        self.ind = jnp.asarray(ind, dtype=jnp.int32)
        ind_ = [i for i in range(self.ndim) if i not in ind]
        self.ind_ = jnp.asarray(ind_, dtype=jnp.int32)
        perm_ = jnp.concatenate([self.ind, self.ind_])
        self.inv_perm = jnp.zeros_like(perm_).at[perm_].set(
            jnp.arange(self.ndim, dtype=jnp.int32))
        # Kept for parity with the PyTorch __init__; the reference forward()
        # never reads `weights` / `ind` / `inv_perm`.
        self.weights = jnp.ones((len(ind), 2), dtype=jnp.float32)

        try:
            self._scalar_scale = float(scale)
            self.scale = self._scalar_scale
        except (TypeError, ValueError):
            self._scalar_scale = None                 # per-feature scale -> XLA path
            self.scale = jnp.asarray(scale, dtype=jnp.float32)

        self.apply_bias = bool(bias)
        if self.apply_bias:
            # Mirrors the reference exactly: bias has shape (len(ind),) and is
            # added to the (..., 2*d) output; like the PyTorch module this only
            # broadcasts when len(ind) is 1 (or 2*d).
            self.bias = jnp.zeros((len(ind),), dtype=jnp.float32)

        self.activation = activation if activation is not None else (lambda y: y)

        self.min_pallas_numel = int(min_pallas_numel)
        self.split_threshold_bytes = int(split_threshold_bytes)
        self.fuse_epilogue = bool(fuse_epilogue)

    # ---- forward paths -------------------------------------------------

    def _xla_forward(self, inputs):
        cos_part = jnp.cos(self.scale * inputs)
        sin_part = jnp.sin(self.scale * inputs)
        out = jnp.concatenate([cos_part, sin_part], axis=-1)
        if self.apply_bias:
            out = out + self.bias
        return self.activation(out)

    def _pallas_forward(self, inputs):
        d = inputs.shape[-1]
        lead = inputs.shape[:-1]
        num_rows = math.prod(lead) if lead else 1
        itemsize = jnp.dtype(inputs.dtype).itemsize

        tb = _plan_row_tile(num_rows, d, itemsize, self.split_threshold_bytes)
        if tb is None:
            # TODO(synk): tile along the feature dim for extremely wide rows.
            return self._xla_forward(inputs)

        x2d = inputs.reshape(num_rows, d)              # free reshape (leading dims)

        bias_row = None
        activation = self.activation
        if self.fuse_epilogue:
            if self.apply_bias:
                bias_row = jnp.broadcast_to(
                    self.bias.astype(jnp.float32), (2 * d,)).reshape(1, 2 * d)
        else:
            activation = (lambda y: y)

        out2d = _periodic_features_pallas(x2d, self._scalar_scale, bias_row,
                                          activation, tb)
        out = out2d.reshape(lead + (2 * d,))           # free reshape

        if not self.fuse_epilogue:
            if self.apply_bias:
                out = out + self.bias
            out = self.activation(out)
        return out

    def __call__(self, inputs):
        n_total = math.prod(inputs.shape)
        if self._scalar_scale is None or n_total < self.min_pallas_numel:
            # TODO(synk): per-feature (array) `scale` is not fused into the
            # kernel; it takes the fused XLA path instead.
            return self._xla_forward(inputs)
        return self._pallas_forward(inputs)


# ---------------------------------------------------------------------------
# Self-test
# ---------------------------------------------------------------------------
def _reference_forward(x, scale, bias=None, act=None):
    out = jnp.concatenate([jnp.cos(scale * x), jnp.sin(scale * x)], axis=-1)
    if bias is not None:
        out = out + bias
    if act is not None:
        out = act(out)
    return out


if __name__ == "__main__":
    key = jax.random.PRNGKey(0)
    k1, k2, k3, k4 = jax.random.split(key, 4)

    # 1) Small f32 case, unaligned feature dim (d=16), single-block fused path.
    batch, ndim = 8, 16
    x1 = jax.random.normal(k1, (batch, ndim), dtype=jnp.float32)
    mod1 = PeriodicFeaturesElementwisePallas(ndim=ndim, ind=[0, 1, 2, 3],
                                             scale=2.0, min_pallas_numel=0)
    out1 = jax.block_until_ready(mod1(x1))
    assert out1.shape == (batch, 2 * ndim), out1.shape
    assert jnp.allclose(out1, _reference_forward(x1, 2.0), atol=1e-5, rtol=1e-5)

    # 2) Multi-step grid with a partial last block (split threshold forced to 0).
    x2 = jax.random.normal(k2, (100, 16), dtype=jnp.float32)
    mod2 = PeriodicFeaturesElementwisePallas(ndim=16, ind=[0, 1], scale=0.5,
                                             min_pallas_numel=0,
                                             split_threshold_bytes=0)
    out2 = jax.block_until_ready(mod2(x2))
    assert out2.shape == (100, 32), out2.shape
    assert jnp.allclose(out2, _reference_forward(x2, 0.5), atol=1e-5, rtol=1e-5)

    # 3) Lane-aligned feature dim (d=128) in bf16: unmasked lane-dense stores,
    #    native-dtype DMA in/out, f32 math inside the kernel.
    x3 = jax.random.normal(k3, (32, 128), dtype=jnp.float32).astype(jnp.bfloat16)
    mod3 = PeriodicFeaturesElementwisePallas(ndim=128, ind=[0], scale=1.0,
                                             min_pallas_numel=0)
    out3 = jax.block_until_ready(mod3(x3))
    ref3 = _reference_forward(x3.astype(jnp.float32), 1.0)
    assert out3.shape == (32, 256), out3.shape
    assert out3.dtype == jnp.bfloat16
    assert jnp.allclose(out3.astype(jnp.float32), ref3, atol=3e-2, rtol=3e-2)

    # 4) Fused bias + activation epilogue (len(ind)==1 so the bias broadcasts,
    #    exactly as the PyTorch reference requires).
    x4 = jax.random.normal(k4, (16, 3, 16), dtype=jnp.float32)
    mod4 = PeriodicFeaturesElementwisePallas(ndim=16, ind=[0], scale=1.5,
                                             bias=True, activation=jnp.tanh,
                                             min_pallas_numel=0)
    mod4.bias = jnp.full((1,), 0.25, dtype=jnp.float32)
    out4 = jax.block_until_ready(mod4(x4))
    ref4 = _reference_forward(x4, 1.5, bias=0.25, act=jnp.tanh)
    assert out4.shape == (16, 3, 32), out4.shape
    assert jnp.allclose(out4, ref4, atol=1e-5, rtol=1e-5)

    print("KERNEL_OK")
</pallas_src>

<mosaic_0001>
module attributes {stable_mosaic.version = 11 : i64} {
  func.func @_periodic_kernel(%arg0: i32, %arg1: memref<8x16xf32, #tpu.memory_space<vmem>>, %arg2: memref<8x32xf32, #tpu.memory_space<vmem>>) attributes {dimension_semantics = [#tpu.dimension_semantics<parallel>], iteration_bounds = array<i64: 1>, scalar_prefetch = 0 : i64, scratch_operands = 0 : i64, tpu.core_type = #tpu.core_type<tc>, window_params = [{transform_indices = @transform_0, window_bounds = array<i64: 8, 16>}, {transform_indices = @transform_1, window_bounds = array<i64: 8, 32>}]} {
    %c0 = arith.constant 0 : index
    %c0_0 = arith.constant 0 : index
    %0 = vector.load %arg1[%c0, %c0_0] : memref<8x16xf32, #tpu.memory_space<vmem>>, vector<8x16xf32>
    %cst = arith.constant 2.000000e+00 : f32
    %1 = vector.broadcast %cst : f32 to vector<8x16xf32>
    %2 = arith.mulf %0, %1 : vector<8x16xf32>
    %3 = math.cos %2 : vector<8x16xf32>
    %4 = math.sin %2 : vector<8x16xf32>
    %5 = tpu.concatenate %3, %4 in 1 : vector<8x16xf32>, vector<8x16xf32> -> vector<8x32xf32>
    %c0_1 = arith.constant 0 : index
    %c0_2 = arith.constant 0 : index
    %6 = vector.load %arg2[%c0_1, %c0_2] : memref<8x32xf32, #tpu.memory_space<vmem>>, vector<8x32xf32>
    tpu.vector_store %arg2[%c0_1, %c0_2], %5 {strides = array<i32>} : memref<8x32xf32, #tpu.memory_space<vmem>>, vector<8x32xf32>,
    return
  }
  func.func @transform_0(%arg0: i32) -> (i32, i32) {
    %c0_i32 = arith.constant 0 : i32
    %c0_i32_0 = arith.constant 0 : i32
    return %arg0, %c0_i32 : i32, i32
  }
  func.func @transform_1(%arg0: i32) -> (i32, i32) {
    %c0_i32 = arith.constant 0 : i32
    %c0_i32_0 = arith.constant 0 : i32
    return %arg0, %c0_i32 : i32, i32
  }
}

</mosaic_0001>

<bundles_post_ra>
// kernel: tpu_custom_call.1
= control target key start
LH: loop header
LB: loop body
LE: loop exit
PB: predicated region body
PF: predicated region fallthrough
CT: control target
= control target key end

     0   :  { %6 = vsyncpa [#allocation3], 0  ;;  %s368_s0 = inlined_call_operand.hbm [shape: f32[8,16], index: 0, kind: input, shape index: {}]   ;;  %s369_s1 = inlined_call_operand.hbm [shape: f32[8,32], index: 1, kind: output, shape index: {}]  }
   0x1   :  { %7 = vsyncpa [#allocation4], 0  ;;  %s322_s6 = smov [#allocation2]  }
   0x2   :  { %s14_s7 = sshll.u32 %s322_s6, 4  ;;  %s15_s7 = int_to_ptr.vmem [resolvable:$true] %s14_s7 }
   0x3   :  { %s286_s8 = scalar_lea.vmem %s15_s7, 128  ;;  %p291_p1 = scmp.lt.s32.totalorder %s15_s7, %s15_s7 }
   0x4   :  { %p287_p0 = scmp.ne.s32.totalorder %s15_s7, %s286_s8  ;;  %p292_p2 = scmp.lt.s32.totalorder %s286_s8, %s286_s8 }
   0x6   :  { %p293_p3 = por %p292_p2, %p291_p1 }
   0x8   :  { %p294_p4 = pnand %p293_p3, %p287_p0 }
   0xa   :  { %297 = shalt.err (!%p294_p4)
}
   0xb   :  { %17 = dma.hbm_to_vmem [thread:$0]  %s368_s0, 128, %s15_s7, [#allocation3]  }
   0xc   :  { %318 = dma.done.wait [#allocation3], 128  }
   0xd   :  { %319 = vsyncadd [#allocation3], 4294967168  ;;  %v21_v0 = vld [vmem:[#allocation2] sm:$0xff]  ;;  %v323_v13 = vmov 683565275   ;;  %s329_s0 = smov 16  }
   0xe   :  { %v344_v1 = vmul.f32 2.0, %v21_v0  ;;  %v324_v15 = vmov 2475754826   ;;  %v325_v17 = vmov 2131351028   ;;  %s330_s11 = smov [#allocation5]  }
   0xf   :  { %v326_v19 = vmov 2102212464   ;;  %v327_v21 = vmov 920167782   ;;  %v328_v28 = vmov 1326507024  }
  0x10   :  { %v26_v2 = vand.u32 2139095040, %v344_v1  ;;  %v23_v4 = vand.u32 2147483647, %v344_v1  ;;  %vm25_vm7 = vcmp.lt.s32.totalorder %v344_v1, 0  ;;  %vm115_vm15 = vweird.f32 %v344_v1  ;;  %s244_s12 = sshll.u32 %s330_s11, 4  ;;  %s245_s12 = int_to_ptr.vmem [resolvable:$true] %s244_s12 }
  0x11   :  { %s298_s13 = scalar_lea.vmem %s245_s12, 128  ;;  %p303_p6 = scmp.lt.s32.totalorder %s245_s12, %s245_s12 }
  0x12   :  { %v27_v3 = vshrl.u32 %v26_v2, 23  ;;  %v30_v7 = vand.u32 8388607, %v23_v4  ;;  %vm24_vm8 = vcmp.le.f32.partialorder %v23_v4, 0.7853982  ;;  %p299_p5 = scmp.ne.s32.totalorder %s245_s12, %s298_s13  ;;  %p304_p7 = scmp.lt.s32.totalorder %s298_s13, %s298_s13 }
  0x14   :  { %v253_v5 = vadd.s32 4294967169, %v27_v3  ;;  %v31_v10 = vor.u32 8388608, %v30_v7  ;;  %p305_p8 = por %p304_p7, %p303_p6 }
  0x16   :  { %v33_v6 = vadd.s32 1, %v253_v5  ;;  %v71_v30 = vshll.u32 %v31_v10, 8  ;;  %p306_p9 = pnand %p305_p8, %p299_p5 }
  0x18   :  { %vm34_vm0 = vcmp.gt.s32.totalorder %v33_v6, 0 }
  0x19   :  { %v35_v8 = vsel %vm34_vm0, %v33_v6, 0  ;;  %vm234_vm0 = vcmask 130048  }
  0x1a   :  { %v37_v9 = vand.u32 31, %v35_v8  ;;  %v36_v11 = vshrl.u32 %v35_v8, 5 }
  0x1c   :  { %v38_v12 = vsub.s32 32, %v37_v9  ;;  %v40_v14 = vshll.u32 %v323_v13, %v37_v9  ;;  %v43_v16 = vshll.u32 %v324_v15, %v37_v9  ;;  %v46_v18 = vshll.u32 %v325_v17, %v37_v9 }
  0x1d   :  { %v49_v20 = vshll.u32 %v326_v19, %v37_v9  ;;  %v52_v22 = vshll.u32 %v327_v21, %v37_v9  ;;  %vm55_vm1 = vcmp.lt.s32.totalorder %v36_v11, 1  ;;  %vm58_vm2 = vcmp.lt.s32.totalorder %v36_v11, 4 }
  0x1e   :  { %v39_v23 = vshrl.u32 %v323_v13, %v38_v12  ;;  %v41_v24 = vshrl.u32 %v324_v15, %v38_v12  ;;  %v44_v25 = vshrl.u32 %v325_v17, %v38_v12  ;;  %v47_v26 = vshrl.u32 %v326_v19, %v38_v12 }
  0x1f   :  { %v50_v27 = vshrl.u32 %v327_v21, %v38_v12  ;;  %v53_v29 = vshrl.u32 %v328_v28, %v38_v12  ;;  %vm56_vm3 = vcmp.lt.s32.totalorder %v36_v11, 2  ;;  %vm57_vm4 = vcmp.lt.s32.totalorder %v36_v11, 3 }
  0x20   :  { %v42_v31 = vor.u32 %v41_v24, %v40_v14  ;;  %v45_v32 = vor.u32 %v44_v25, %v43_v16  ;;  %v48_v33 = vor.u32 %v47_v26, %v46_v18 }
  0x21   :  { %v51_v34 = vor.u32 %v50_v27, %v49_v20  ;;  %v54_v35 = vor.u32 %v53_v29, %v52_v22 }
  0x22   :  { %v59_v36 = vsel %vm55_vm1, %v39_v23, %v42_v31  ;;  %v60_v37 = vsel %vm58_vm2, %v48_v33, 2102212464  ;;  %v63_v38 = vsel %vm55_vm1, %v42_v31, %v45_v32  ;;  %v67_v39 = vsel %vm55_vm1, %v45_v32, %v48_v33 }
  0x23   :  { %v61_v40 = vsel %vm57_vm4, %v45_v32, %v60_v37  ;;  %v64_v41 = vsel %vm58_vm2, %v51_v34, 920167782  ;;  %v68_v42 = vsel %vm58_vm2, %v54_v35, 1326507024  ;;  %vm236_vm1 = vcmask 261120  }
  0x24   :  { %v65_v43 = vsel %vm57_vm4, %v48_v33, %v64_v41  ;;  %v69_v44 = vsel %vm57_vm4, %v51_v34, %v68_v42  ;;  %v62_v45 = vsel %vm56_vm3, %v59_v36, %v61_v40 }
  0x25   :  { %v66_v46 = vsel %vm56_vm3, %v63_v38, %v65_v43  ;;  %v70_v47 = vsel %vm56_vm3, %v67_v39, %v69_v44  ;;  %v78_v52 = vmul.u32 %v71_v30, %v62_v45 }
  0x26   :  { %v350_v48 = vmul.u32.u64.low %v71_v30, %v70_v47  ;;  %v351_v49 = vmul.u32.u64.high %v71_v30, %v70_v47, %v350_v48  ;;  %v353_v50 = vmul.u32.u64.low %v71_v30, %v66_v46  ;;  %v354_v51 = vmul.u32.u64.high %v71_v30, %v66_v46, %v353_v50 }
  0x28   :  { %vm80_vm5 = vc.u32 %v351_v49, %v353_v50  ;;  %v81_v53 = vadd.s32 1, %v354_v51  ;;  %v79_v0 = vadd.s32 %v353_v50, %v351_v49 }
  0x2a   :  { %v82_v54 = vsel %vm80_vm5, %v81_v53, %v354_v51 }
  0x2b   :  { %v83_v55 = vadd.s32 %v82_v54, %v78_v52 }
  0x2d   :  { %v84_v56 = vadd.s32 536870912, %v83_v55 }
  0x2f   :  { %v85_v57 = vshrl.u32 %v84_v56, 30 }
  0x31   :  { %v86_v58 = vshll.u32 %v85_v57, 30  ;;  %v109_v15 = vsub.s32 4, %v85_v57 }
  0x33   :  { %v87_v59 = vsub.s32 %v83_v55, %v86_v58  ;;  %v110_v18 = vsel %vm25_vm7, %v109_v15, %v85_v57 }
  0x34   :  { %v112_v20 = vsel %vm24_vm8, 0, %v110_v18 }
  0x35   :  { %v89_v60 = vsub.s32 0, %v87_v59  ;;  %v219_v21 = vadd.s32 3, %v112_v20  ;;  %v116_v22 = vand.u32 3, %v112_v20 }
  0x37   :  { %v254_v61 = vmin.u32 %v89_v60, %v87_v59  ;;  %v220_v23 = vand.u32 3, %v219_v21  ;;  %vm121_vm9 = vcmp.eq.s32.totalorder %v116_v22, 2  ;;  %vm118_vm11 = vcmp.eq.s32.totalorder %v116_v22, 0 }
  0x38   :  { %vm117_vm13 = vcmp.lt.s32.totalorder %v116_v22, 2 }
  0x39   :  { %v91_v62 = vclz %v254_v61  ;;  %vm225_vm10 = vcmp.eq.s32.totalorder %v220_v23, 2  ;;  %vm222_vm12 = vcmp.eq.s32.totalorder %v220_v23, 0  ;;  %vm221_vm14 = vcmp.lt.s32.totalorder %v220_v23, 2 }
  0x3b   :  { %v255_v63 = vadd.s32 4294967294, %v91_v62 }
  0x3d   :  { %vm256_vm6 = vcmp.lt.s32.totalorder %v255_v63, 0 }
  0x3e   :  { %v94_v2 = vsel %vm256_vm6, 0, %v255_v63 }
  0x3f   :  { %v95_v3 = vsub.s32 32, %v94_v2  ;;  %v96_v5 = vshll.u32 %v87_v59, %v94_v2  ;;  %v99_v6 = vsub.s32 4294967266, %v94_v2 }
  0x41   :  { %v97_v7 = vshrl.u32 %v79_v0, %v95_v3  ;;  %v100_v8 = vadd.s32 127, %v99_v6 }
  0x43   :  { %v98_v9 = vor.u32 %v97_v7, %v96_v5  ;;  %v101_v10 = vshll.u32 %v100_v8, 23 }
  0x45   :  { %v102_v11 = vor.u32 4788187, %v101_v10  ;;  %v105_v12 = vcvt.s32.f32 %v98_v9 }
  0x47   :  { %v103_v13 = vand.u32 2147483647, %v102_v11 }
  0x49   :  { %v106_v14 = vmul.f32 %v105_v12, %v103_v13 }
  0x4b   :  { %v107_v16 = vxor.u32 2147483648, %v106_v14 }
  0x4d   :  { %v108_v17 = vsel %vm25_vm7, %v107_v16, %v106_v14 }
  0x4e   :  { %v111_v19 = vsel %vm24_vm8, %v344_v1, %v108_v17 }
  0x4f   :  { %274 = vcosq.f32 %v111_v19 }
  0x50   :  { %276 = vsinq.f32 %v111_v19 }
  0x5c   :  { %v275_v24 = vpop.eup %274 }
  0x5d   :  { %v277_v25 = vpop.eup %276  ;;  %v122_v26 = vxor.u32 2147483648, %v275_v24 }
  0x5e   :  { %v119_v4 = vxor.u32 2147483648, %v277_v25 }
  0x5f   :  { %v123_v27 = vsel %vm121_vm9, %v122_v26, %v277_v25  ;;  %v227_v28 = vsel %vm225_vm10, %v122_v26, %v277_v25 }
  0x60   :  { %v120_v29 = vsel %vm118_vm11, %v275_v24, %v119_v4  ;;  %v224_v30 = vsel %vm222_vm12, %v275_v24, %v119_v4 }
  0x61   :  { %v124_v31 = vsel %vm117_vm13, %v120_v29, %v123_v27  ;;  %v228_v32 = vsel %vm221_vm14, %v224_v30, %v227_v28 }
  0x62   :  { %v125_v33 = vsel %vm115_vm15, nan, %v124_v31  ;;  %v229_v34 = vsel %vm115_vm15, nan, %v228_v32 }
  0x63   :  { %231 = vrot.lane.b32.xlu0 %v229_v34, %s329_s0 }
  0xd5   :  { %v232_v35 = vpop.permute.xlu0 %231 }
  0xd6   :  { %v235_v36 = vsel %vm234_vm0, %v125_v33, %v232_v35 }
  0xd7   :  { %237 = vst.msk [vmem:[#allocation5] sm:$0xff] %vm236_vm1, %v235_v36 }
  0xd8   :  { %309 = shalt.err (!%p306_p9)
}
  0xd9   :  { %247 = dma.vmem_to_hbm [thread:$0]  %s245_s12, 128, %s369_s1, [#allocation4]  }
  0xda   :  { %320 = dma.done.wait [#allocation4], 128  }
  0xdb   :  { %321 = vsyncadd [#allocation4], 4294967168 }
  0xdc   :  { %251 = vsyncpa [#allocation3], 1 }
  0xdd   :  { %252 = vsyncpa [#allocation4], 1 }

</bundles_post_ra>
